<compile_context>
chip_gen: v6e
topology: v6e:2x2x1
jax: 0.10.0
libtpu: 0.0.40
codegen_flags: <defaults>
</compile_context>

<pallas_src>
import jax
import jax.numpy as jnp
from jax.experimental import pallas as pl
from jax.experimental.pallas import tpu as pltpu

IN_DIM = 14
HID_DIM = 4
_P_ROWS = IN_DIM + HID_DIM + 2   # packed params buffer: (20, 14)


def _round_up(n, m):
    return ((n + m - 1) // m) * m


def _pack_params(w1, b1, w2, b2):
    """Pack all parameters into one small f32 buffer (batch-major orientation).

    Layout of the (20, 14) buffer:
      [0:14, 0:4]  = W1  (14, 4)   for  x @ W1
      [14:18, :]   = W2  (4, 14)   for  h @ W2
      [18, 0:4]    = b1  (4,)
      [19, :]      = b2  (14,)
    """
    p = jnp.zeros((_P_ROWS, IN_DIM), jnp.float32)
    p = p.at[:IN_DIM, :HID_DIM].set(w1.astype(jnp.float32))
    p = p.at[IN_DIM:IN_DIM + HID_DIM, :].set(w2.astype(jnp.float32))
    p = p.at[IN_DIM + HID_DIM, :HID_DIM].set(b1.astype(jnp.float32))
    p = p.at[IN_DIM + HID_DIM + 1, :].set(b2.astype(jnp.float32))
    return p


def _mlp_kernel(params_ref, x_ref, out_ref):
    p = params_ref[...]                                        # (20, 14) f32, resident
    w1 = p[:IN_DIM, :HID_DIM]                                  # (14, 4)
    w2 = p[IN_DIM:IN_DIM + HID_DIM, :]                         # (4, 14)
    b1 = p[IN_DIM + HID_DIM:IN_DIM + HID_DIM + 1, :HID_DIM]    # (1, 4)
    b2 = p[IN_DIM + HID_DIM + 1:IN_DIM + HID_DIM + 2, :]       # (1, 14)

    x = x_ref[...].astype(jnp.float32)                         # (tb, 14), batch-major

    # squeeze: Linear(14 -> 4) + ReLU
    h = jnp.dot(x, w1, preferred_element_type=jnp.float32) + b1
    h = jnp.maximum(h, 0.0)

    # expand: Linear(4 -> 14)
    y = jnp.dot(h, w2, preferred_element_type=jnp.float32) + b2
    out_ref[...] = y.astype(out_ref.dtype)


def _choose_tile(padded_b, block_batch):
    """Largest multiple-of-128 tile that divides padded_b, bounded by block_batch and
    (when possible) by padded_b // 2 so a 'parallel' grid keeps >= 2 steps (v7x)."""
    cap = min(block_batch, padded_b)
    if padded_b >= 256:
        cap = min(cap, padded_b // 2)
    cap = max(128, (cap // 128) * 128)
    n128 = padded_b // 128
    best = 1
    for d in range(1, n128 + 1):
        if n128 % d == 0 and d * 128 <= cap:
            best = d
    return best * 128


def simple_network_forward(x, w1, b1, w2, b2, *, block_batch=16384):
    """x: (B, 14) -> (B, 14). Natural batch-major layout; no wrapper transposes."""
    B = x.shape[0]
    params = _pack_params(w1, b1, w2, b2)

    padded_b = _round_up(B, 128)                 # <=127 rows of padding, independent of tb
    tb = _choose_tile(padded_b, block_batch)

    x_p = x if padded_b == B else jnp.pad(x, ((0, padded_b - B), (0, 0)))

    itemsize = jnp.dtype(x.dtype).itemsize
    cost = pl.CostEstimate(
        flops=4 * padded_b * IN_DIM * HID_DIM + 3 * padded_b * (IN_DIM + HID_DIM),
        transcendentals=0,
        bytes_accessed=2 * padded_b * IN_DIM * itemsize + _P_ROWS * IN_DIM * 4,
    )

    out_p = pl.pallas_call(
        _mlp_kernel,
        out_shape=jax.ShapeDtypeStruct((padded_b, IN_DIM), x.dtype),
        grid=(padded_b // tb,),
        in_specs=[
            pl.BlockSpec((_P_ROWS, IN_DIM), lambda i: (0, 0)),   # packed params, constant
            pl.BlockSpec((tb, IN_DIM), lambda i: (i, 0)),        # x batch tile
        ],
        out_specs=pl.BlockSpec((tb, IN_DIM), lambda i: (i, 0)),
        compiler_params=pltpu.CompilerParams(
            dimension_semantics=("parallel",),                   # v7x: shard across 2 TCs
        ),
        cost_estimate=cost,
    )(params, x_p)

    return out_p if padded_b == B else out_p[:B]


def init_params(key):
    """Deterministic init matching nn.Linear's default U(-1/sqrt(fan_in), 1/sqrt(fan_in))."""
    k1, k2, k3, k4 = jax.random.split(key, 4)
    bound1 = 1.0 / jnp.sqrt(float(IN_DIM))
    bound2 = 1.0 / jnp.sqrt(float(HID_DIM))
    # Stored as (in, out) so the math is x @ W (equivalent to PyTorch's x @ W.T).
    w1 = jax.random.uniform(k1, (IN_DIM, HID_DIM), jnp.float32, -bound1, bound1)
    b1 = jax.random.uniform(k2, (HID_DIM,), jnp.float32, -bound1, bound1)
    w2 = jax.random.uniform(k3, (HID_DIM, IN_DIM), jnp.float32, -bound2, bound2)
    b2 = jax.random.uniform(k4, (IN_DIM,), jnp.float32, -bound2, bound2)
    return w1, b1, w2, b2


if __name__ == "__main__":
    key = jax.random.PRNGKey(0)
    k_x, k_p = jax.random.split(key)
    w1, b1, w2, b2 = init_params(k_p)

    # Small check (single tile, ragged B -> padded to 128 and sliced back).
    B = 8
    x = jax.random.normal(k_x, (B, IN_DIM), jnp.float32)
    out = jax.block_until_ready(simple_network_forward(x, w1, b1, w2, b2))
    ref = jnp.maximum(x @ w1 + b1, 0.0) @ w2 + b2
    assert out.shape == (B, IN_DIM)
    assert jnp.allclose(out, ref, atol=1e-5, rtol=1e-5)

    # Multi-step batch grid (B=300 -> 3 tiles of 128) + 'parallel' semantics path.
    B2 = 300
    x2 = jax.random.normal(jax.random.PRNGKey(1), (B2, IN_DIM), jnp.float32)
    out2 = jax.block_until_ready(
        simple_network_forward(x2, w1, b1, w2, b2, block_batch=128))
    ref2 = jnp.maximum(x2 @ w1 + b1, 0.0) @ w2 + b2
    assert out2.shape == (B2, IN_DIM)
    assert jnp.allclose(out2, ref2, atol=1e-5, rtol=1e-5)

    print("KERNEL_OK")
</pallas_src>

<mosaic_0001>
module attributes {stable_mosaic.version = 11 : i64} {
  func.func @_mlp_kernel(%arg0: i32, %arg1: memref<20x14xf32, #tpu.memory_space<vmem>>, %arg2: memref<128x14xf32, #tpu.memory_space<vmem>>, %arg3: memref<128x14xf32, #tpu.memory_space<vmem>>) attributes {dimension_semantics = [#tpu.dimension_semantics<parallel>], iteration_bounds = array<i64: 1>, scalar_prefetch = 0 : i64, scratch_operands = 0 : i64, tpu.core_type = #tpu.core_type<tc>, window_params = [{pipeline_mode = #tpu.pipeline_mode<synchronous>, transform_indices = @transform_0, window_bounds = array<i64: 20, 14>}, {transform_indices = @transform_1, window_bounds = array<i64: 128, 14>}, {transform_indices = @transform_2, window_bounds = array<i64: 128, 14>}]} {
    %c0 = arith.constant 0 : index
    %c0_0 = arith.constant 0 : index
    %0 = vector.load %arg1[%c0, %c0_0] : memref<20x14xf32, #tpu.memory_space<vmem>>, vector<20x14xf32>
    %1 = vector.extract_strided_slice %0 {offsets = [0, 0], sizes = [14, 4], strides = [1, 1]} : vector<20x14xf32> to vector<14x4xf32>
    %2 = vector.extract_strided_slice %0 {offsets = [14, 0], sizes = [4, 14], strides = [1, 1]} : vector<20x14xf32> to vector<4x14xf32>
    %3 = vector.extract_strided_slice %0 {offsets = [18, 0], sizes = [1, 4], strides = [1, 1]} : vector<20x14xf32> to vector<1x4xf32>
    %4 = vector.extract_strided_slice %0 {offsets = [19, 0], sizes = [1, 14], strides = [1, 1]} : vector<20x14xf32> to vector<1x14xf32>
    %c0_1 = arith.constant 0 : index
    %c0_2 = arith.constant 0 : index
    %5 = vector.load %arg2[%c0_1, %c0_2] : memref<128x14xf32, #tpu.memory_space<vmem>>, vector<128x14xf32>
    %cst = arith.constant dense<0.000000e+00> : vector<128x4xf32>
    %6 = tpu.matmul %5, %1, %cst {dimension_numbers = #tpu.dot_dimension_numbers<[1], [0], [0], [1], [0, 0, 1, 1], [], []>} : vector<128x14xf32>, vector<14x4xf32>, vector<128x4xf32> -> vector<128x4xf32>
    %7 = vector.broadcast %3 : vector<1x4xf32> to vector<128x4xf32>
    %8 = arith.addf %6, %7 : vector<128x4xf32>
    %cst_3 = arith.constant 0.000000e+00 : f32
    %9 = vector.broadcast %cst_3 : f32 to vector<128x4xf32>
    %10 = arith.maximumf %8, %9 : vector<128x4xf32>
    %cst_4 = arith.constant dense<0.000000e+00> : vector<128x14xf32>
    %11 = tpu.matmul %10, %2, %cst_4 {dimension_numbers = #tpu.dot_dimension_numbers<[1], [0], [0], [1], [0, 0, 1, 1], [], []>} : vector<128x4xf32>, vector<4x14xf32>, vector<128x14xf32> -> vector<128x14xf32>
    %12 = vector.broadcast %4 : vector<1x14xf32> to vector<128x14xf32>
    %13 = arith.addf %11, %12 : vector<128x14xf32>
    %c0_5 = arith.constant 0 : index
    %c0_6 = arith.constant 0 : index
    %14 = vector.load %arg3[%c0_5, %c0_6] : memref<128x14xf32, #tpu.memory_space<vmem>>, vector<128x14xf32>
    tpu.vector_store %arg3[%c0_5, %c0_6], %13 {strides = array<i32>} : memref<128x14xf32, #tpu.memory_space<vmem>>, vector<128x14xf32>,
    return
  }
  func.func @transform_0(%arg0: i32) -> (i32, i32) {
    %c0_i32 = arith.constant 0 : i32
    %c0_i32_0 = arith.constant 0 : i32
    %c0_i32_1 = arith.constant 0 : i32
    return %c0_i32, %c0_i32_0 : i32, i32
  }
  func.func @transform_1(%arg0: i32) -> (i32, i32) {
    %c0_i32 = arith.constant 0 : i32
    %c0_i32_0 = arith.constant 0 : i32
    return %arg0, %c0_i32 : i32, i32
  }
  func.func @transform_2(%arg0: i32) -> (i32, i32) {
    %c0_i32 = arith.constant 0 : i32
    %c0_i32_0 = arith.constant 0 : i32
    return %arg0, %c0_i32 : i32, i32
  }
}

</mosaic_0001>

<bundles_post_ra>
// kernel: tpu_custom_call.1
= control target key start
LH: loop header
LB: loop body
LE: loop exit
PB: predicated region body
PF: predicated region fallthrough
CT: control target
= control target key end

     0   :  { %vm83_vm0 = vcmask 1045504   ;;  %vm34_vm1 = vcmask 113664   ;;  %vm253_vm2 = vcmask 1041408   ;;  %vm306_vm3 = vcmask 1043456   ;;  %s774_s0 = inlined_call_operand.vmem [shape: f32[20,14], index: 0, kind: input, shape index: {}]   ;;  %s775_s1 = inlined_call_operand.vmem [shape: f32[128,14], index: 1, kind: input, shape index: {}]   ;;  %s776_s2 = inlined_call_operand.vmem [shape: f32[128,14], index: 2, kind: output, shape index: {}]  }
   0x1   :  { %v12_v0 = vld [vmem:[%s774_s0 + $0x8] sm:$0xff]  ;;  %v11_v1 = vld [vmem:[%s774_s0] sm:$0xff]  ;;  %v16_v4 = vld [vmem:[%s775_s1 + $0x10] sm:$0xff]  ;;  %v30_v22 = vlaneseq  ;;  %vm257_vm4 = vcmask 31744  }
   0x2   :  { %543 = vmatprep.subr.msk.mxu0 %vm83_vm0, %v12_v0  ;;  %v14_v2 = vld [vmem:[%s775_s1] sm:$0xff]  ;;  %v15_v3 = vld [vmem:[%s775_s1 + $0x8] sm:$0xff]  ;;  %v17_v5 = vld [vmem:[%s775_s1 + $0x18] sm:$0xff]  ;;  %v254_v18 = vrot.slane %v12_v0, 6 }
   0x3   :  { %544 = vmatpush3.msk.msra.mxu0 %vm83_vm0, %v12_v0  ;;  %547 = vmatprep.mubr.msk.f32.mxu0 %vm34_vm1, %v14_v2  ;;  %v18_v6 = vld [vmem:[%s775_s1 + $0x20] sm:$0xff]  ;;  %v19_v7 = vld [vmem:[%s775_s1 + $0x28] sm:$0xff]  ;;  %v20_v8 = vld [vmem:[%s775_s1 + $0x30] sm:$0xff]  ;;  %v688_v23 = vshrl.u32 %v30_v22, 7 }
   0x4   :  { %545 = vmatprep.subr.mxu0 %v11_v1  ;;  %v21_v9 = vld [vmem:[%s775_s1 + $0x38] sm:$0xff]  ;;  %v22_v10 = vld [vmem:[%s775_s1 + $0x40] sm:$0xff]  ;;  %v23_v11 = vld [vmem:[%s775_s1 + $0x48] sm:$0xff] }
   0x5   :  { %546 = vmatpush3.msra.mxu0 %v11_v1  ;;  %v24_v12 = vld [vmem:[%s775_s1 + $0x50] sm:$0xff]  ;;  %v25_v13 = vld [vmem:[%s775_s1 + $0x58] sm:$0xff]  ;;  %v26_v14 = vld [vmem:[%s775_s1 + $0x60] sm:$0xff]  ;;  %v32_v24 = vsub.s32 2, %v688_v23 }
   0x6   :  { %548 = vmatmul.mubr.msk.f32.vlgmr.msra.gmra.mxu0 %vm34_vm1, %v15_v3  ;;  %v27_v15 = vld [vmem:[%s775_s1 + $0x68] sm:$0xff]  ;;  %v28_v16 = vld [vmem:[%s775_s1 + $0x70] sm:$0xff]  ;;  %v29_v17 = vld [vmem:[%s775_s1 + $0x78] sm:$0xff] }
   0x7   :  { %550 = vmatprep.mubr.msk.f32.mxu0 %vm34_vm1, %v16_v4  ;;  %v685_v19 = vld [vmem:[%s774_s0 + $0x10] sm:$0xf] }
   0x8   :  { %v255_v20 = vrot.slane %v685_v19, 6  ;;  %v33_v25 = vrot.slane %v685_v19, %v32_v24 }
   0xa   :  { %551 = vmatmul.mubr.msk.f32.gmra.mxu0 %vm34_vm1, %v17_v5  ;;  %v256_v21 = vsel %vm253_vm2, %v254_v18, %v255_v20 }
   0xb   :  { %553 = vmatprep.mubr.msk.f32.mxu0 %vm34_vm1, %v18_v6  ;;  %571 = vmatprep.subr.msk.mxu1 %vm306_vm3, %v256_v21 }
   0xc   :  { %572 = vmatpush3.msk.msra.mxu1 %vm306_vm3, %v256_v21 }
   0xe   :  { %554 = vmatmul.mubr.msk.f32.gmra.mxu0 %vm34_vm1, %v19_v7 }
   0xf   :  { %556 = vmatprep.mubr.msk.f32.mxu0 %vm34_vm1, %v20_v8 }
  0x12   :  { %557 = vmatmul.mubr.msk.f32.gmra.mxu0 %vm34_vm1, %v21_v9 }
  0x13   :  { %559 = vmatprep.mubr.msk.f32.mxu0 %vm34_vm1, %v22_v10  ;;  %v250_v10 = vsub.s32 3, %v688_v23 }
  0x16   :  { %560 = vmatmul.mubr.msk.f32.gmra.mxu0 %vm34_vm1, %v23_v11  ;;  %v251_v11 = vrot.slane %v685_v19, %v250_v10 }
  0x17   :  { %562 = vmatprep.mubr.msk.f32.mxu0 %vm34_vm1, %v24_v12 }
  0x1a   :  { %563 = vmatmul.mubr.msk.f32.gmra.mxu0 %vm34_vm1, %v25_v13 }
  0x1b   :  { %565 = vmatprep.mubr.msk.f32.mxu0 %vm34_vm1, %v26_v14 }
  0x1e   :  { %566 = vmatmul.mubr.msk.f32.gmra.mxu0 %vm34_vm1, %v27_v15 }
  0x1f   :  { %568 = vmatprep.mubr.msk.f32.mxu0 %vm34_vm1, %v28_v16 }
  0x22   :  { %569 = vmatmul.mubr.msk.f32.gmra.mxu0 %vm34_vm1, %v29_v17 }
  0xc6   :  { %v549_v26 = vpop.f32.mrf.mxu0 }
  0xc7   :  { %v159_v27 = vadd.f32 %v549_v26, %v33_v25 }
  0xc8   :  { %v153_v28 = vpop.f32.mrf.mxu0 }
  0xc9   :  { %v154_v29 = vadd.f32 %v153_v28, %v33_v25  ;;  %v233_v32 = vmax.f32 %v159_v27, 0.0 }
  0xca   :  { %v552_v30 = vpop.f32.mrf.mxu0 }
  0xcb   :  { %v232_v31 = vmax.f32 %v154_v29, 0.0  ;;  %v169_v33 = vadd.f32 %v552_v30, %v33_v25 }
  0xcc   :  { %v163_v34 = vpop.f32.mrf.mxu0 }
  0xcd   :  { %v164_v35 = vadd.f32 %v163_v34, %v33_v25  ;;  %573 = vmatprep.mubr.msk.f32.mxu1 %vm257_vm4, %v232_v31  ;;  %v235_v38 = vmax.f32 %v169_v33, 0.0 }
  0xce   :  { %v555_v36 = vpop.f32.mrf.mxu0  ;;  %574 = vmatmul.mubr.msk.f32.vlgmr.msra.gmra.mxu1 %vm257_vm4, %v233_v32 }
  0xcf   :  { %v234_v37 = vmax.f32 %v164_v35, 0.0  ;;  %v179_v39 = vadd.f32 %v555_v36, %v33_v25 }
  0xd0   :  { %v173_v40 = vpop.f32.mrf.mxu0 }
  0xd1   :  { %v174_v41 = vadd.f32 %v173_v40, %v33_v25  ;;  %576 = vmatprep.mubr.msk.f32.mxu1 %vm257_vm4, %v234_v37  ;;  %v237_v44 = vmax.f32 %v179_v39, 0.0 }
  0xd2   :  { %v558_v42 = vpop.f32.mrf.mxu0  ;;  %577 = vmatmul.mubr.msk.f32.gmra.mxu1 %vm257_vm4, %v235_v38 }
  0xd3   :  { %v236_v43 = vmax.f32 %v174_v41, 0.0  ;;  %v189_v45 = vadd.f32 %v558_v42, %v33_v25 }
  0xd4   :  { %v183_v46 = vpop.f32.mrf.mxu0 }
  0xd5   :  { %v184_v47 = vadd.f32 %v183_v46, %v33_v25  ;;  %579 = vmatprep.mubr.msk.f32.mxu1 %vm257_vm4, %v236_v43  ;;  %v239_v50 = vmax.f32 %v189_v45, 0.0 }
  0xd6   :  { %v561_v48 = vpop.f32.mrf.mxu0  ;;  %580 = vmatmul.mubr.msk.f32.gmra.mxu1 %vm257_vm4, %v237_v44 }
  0xd7   :  { %v238_v49 = vmax.f32 %v184_v47, 0.0  ;;  %v199_v51 = vadd.f32 %v561_v48, %v33_v25 }
  0xd8   :  { %v193_v52 = vpop.f32.mrf.mxu0 }
  0xd9   :  { %v194_v53 = vadd.f32 %v193_v52, %v33_v25  ;;  %582 = vmatprep.mubr.msk.f32.mxu1 %vm257_vm4, %v238_v49  ;;  %v241_v56 = vmax.f32 %v199_v51, 0.0 }
  0xda   :  { %v564_v54 = vpop.f32.mrf.mxu0  ;;  %583 = vmatmul.mubr.msk.f32.gmra.mxu1 %vm257_vm4, %v239_v50 }
  0xdb   :  { %v240_v55 = vmax.f32 %v194_v53, 0.0  ;;  %v209_v57 = vadd.f32 %v564_v54, %v33_v25 }
  0xdc   :  { %v203_v58 = vpop.f32.mrf.mxu0 }
  0xdd   :  { %v204_v59 = vadd.f32 %v203_v58, %v33_v25  ;;  %585 = vmatprep.mubr.msk.f32.mxu1 %vm257_vm4, %v240_v55  ;;  %v243_v62 = vmax.f32 %v209_v57, 0.0 }
  0xde   :  { %v567_v60 = vpop.f32.mrf.mxu0  ;;  %586 = vmatmul.mubr.msk.f32.gmra.mxu1 %vm257_vm4, %v241_v56 }
  0xdf   :  { %v242_v61 = vmax.f32 %v204_v59, 0.0  ;;  %v219_v63 = vadd.f32 %v567_v60, %v33_v25 }
  0xe0   :  { %v213_v0 = vpop.f32.mrf.mxu0 }
  0xe1   :  { %v214_v1 = vadd.f32 %v213_v0, %v33_v25  ;;  %588 = vmatprep.mubr.msk.f32.mxu1 %vm257_vm4, %v242_v61  ;;  %v245_v4 = vmax.f32 %v219_v63, 0.0 }
  0xe2   :  { %v570_v2 = vpop.f32.mrf.mxu0  ;;  %589 = vmatmul.mubr.msk.f32.gmra.mxu1 %vm257_vm4, %v243_v62 }
  0xe3   :  { %v244_v3 = vmax.f32 %v214_v1, 0.0  ;;  %v229_v5 = vadd.f32 %v570_v2, %v33_v25 }
  0xe4   :  { %v223_v6 = vpop.f32.mrf.mxu0 }
  0xe5   :  { %v224_v7 = vadd.f32 %v223_v6, %v33_v25  ;;  %591 = vmatprep.mubr.msk.f32.mxu1 %vm257_vm4, %v244_v3  ;;  %v247_v9 = vmax.f32 %v229_v5, 0.0 }
  0xe6   :  { %592 = vmatmul.mubr.msk.f32.gmra.mxu1 %vm257_vm4, %v245_v4 }
  0xe7   :  { %v246_v8 = vmax.f32 %v224_v7, 0.0 }
  0xe9   :  { %594 = vmatprep.mubr.msk.f32.mxu1 %vm257_vm4, %v246_v8 }
  0xea   :  { %595 = vmatmul.mubr.msk.f32.gmra.mxu1 %vm257_vm4, %v247_v9 }
 0x18e   :  { %v575_v12 = vpop.f32.mrf.mxu1 }
 0x18f   :  { %v381_v13 = vadd.f32 %v575_v12, %v251_v11 }
 0x190   :  { %v375_v14 = vpop.f32.mrf.mxu1 }
 0x191   :  { %455 = vst.msk [vmem:[%s776_s2 + $0x8] sm:$0xff] %vm34_vm1, %v381_v13  ;;  %v376_v15 = vadd.f32 %v375_v14, %v251_v11 }
 0x192   :  { %v578_v16 = vpop.f32.mrf.mxu1 }
 0x193   :  { %454 = vst.msk [vmem:[%s776_s2] sm:$0xff] %vm34_vm1, %v376_v15  ;;  %v391_v17 = vadd.f32 %v578_v16, %v251_v11 }
 0x194   :  { %v385_v18 = vpop.f32.mrf.mxu1 }
 0x195   :  { %457 = vst.msk [vmem:[%s776_s2 + $0x18] sm:$0xff] %vm34_vm1, %v391_v17  ;;  %v386_v19 = vadd.f32 %v385_v18, %v251_v11 }
 0x196   :  { %v581_v20 = vpop.f32.mrf.mxu1 }
 0x197   :  { %456 = vst.msk [vmem:[%s776_s2 + $0x10] sm:$0xff] %vm34_vm1, %v386_v19  ;;  %v401_v21 = vadd.f32 %v581_v20, %v251_v11 }
 0x198   :  { %v395_v22 = vpop.f32.mrf.mxu1 }
 0x199   :  { %459 = vst.msk [vmem:[%s776_s2 + $0x28] sm:$0xff] %vm34_vm1, %v401_v21  ;;  %v396_v23 = vadd.f32 %v395_v22, %v251_v11 }
 0x19a   :  { %v584_v24 = vpop.f32.mrf.mxu1 }
 0x19b   :  { %458 = vst.msk [vmem:[%s776_s2 + $0x20] sm:$0xff] %vm34_vm1, %v396_v23  ;;  %v411_v25 = vadd.f32 %v584_v24, %v251_v11 }
 0x19c   :  { %v405_v26 = vpop.f32.mrf.mxu1 }
 0x19d   :  { %461 = vst.msk [vmem:[%s776_s2 + $0x38] sm:$0xff] %vm34_vm1, %v411_v25  ;;  %v406_v27 = vadd.f32 %v405_v26, %v251_v11 }
 0x19e   :  { %v587_v28 = vpop.f32.mrf.mxu1 }
 0x19f   :  { %460 = vst.msk [vmem:[%s776_s2 + $0x30] sm:$0xff] %vm34_vm1, %v406_v27  ;;  %v421_v29 = vadd.f32 %v587_v28, %v251_v11 }
 0x1a0   :  { %v415_v30 = vpop.f32.mrf.mxu1 }
 0x1a1   :  { %463 = vst.msk [vmem:[%s776_s2 + $0x48] sm:$0xff] %vm34_vm1, %v421_v29  ;;  %v416_v31 = vadd.f32 %v415_v30, %v251_v11 }
 0x1a2   :  { %v590_v32 = vpop.f32.mrf.mxu1 }
 0x1a3   :  { %462 = vst.msk [vmem:[%s776_s2 + $0x40] sm:$0xff] %vm34_vm1, %v416_v31  ;;  %v431_v33 = vadd.f32 %v590_v32, %v251_v11 }
 0x1a4   :  { %v425_v34 = vpop.f32.mrf.mxu1 }
 0x1a5   :  { %465 = vst.msk [vmem:[%s776_s2 + $0x58] sm:$0xff] %vm34_vm1, %v431_v33  ;;  %v426_v35 = vadd.f32 %v425_v34, %v251_v11 }
 0x1a6   :  { %v593_v36 = vpop.f32.mrf.mxu1 }
 0x1a7   :  { %464 = vst.msk [vmem:[%s776_s2 + $0x50] sm:$0xff] %vm34_vm1, %v426_v35  ;;  %v441_v37 = vadd.f32 %v593_v36, %v251_v11 }
 0x1a8   :  { %v435_v38 = vpop.f32.mrf.mxu1 }
 0x1a9   :  { %467 = vst.msk [vmem:[%s776_s2 + $0x68] sm:$0xff] %vm34_vm1, %v441_v37  ;;  %v436_v39 = vadd.f32 %v435_v38, %v251_v11 }
 0x1aa   :  { %v596_v40 = vpop.f32.mrf.mxu1 }
 0x1ab   :  { %466 = vst.msk [vmem:[%s776_s2 + $0x60] sm:$0xff] %vm34_vm1, %v436_v39  ;;  %v451_v41 = vadd.f32 %v596_v40, %v251_v11 }
 0x1ac   :  { %v445_v42 = vpop.f32.mrf.mxu1 }
 0x1ad   :  { %469 = vst.msk [vmem:[%s776_s2 + $0x78] sm:$0xff] %vm34_vm1, %v451_v41  ;;  %v446_v43 = vadd.f32 %v445_v42, %v251_v11 }
 0x1af   :  { %468 = vst.msk [vmem:[%s776_s2 + $0x70] sm:$0xff] %vm34_vm1, %v446_v43 }

</bundles_post_ra>
